<compile_context>
chip_gen: v7x
topology: tpu7x:2x2x1
jax: 0.10.0
libtpu: 0.0.40
codegen_flags: <defaults>
</compile_context>

<pallas_src>
import jax
import jax.numpy as jnp
from jax.experimental import pallas as pl
from jax.experimental.pallas import tpu as pltpu


# ---------------------------------------------------------------------------
# Kernels
# ---------------------------------------------------------------------------
def _glu_kernel_single_k(x_ref, wo_ref, wg_ref, bo_ref, bg_ref, o_ref):
    # Entire K fits in one block: dot -> bias -> sigmoid -> store, all in vregs.
    x = x_ref[...]
    y_o = jnp.dot(x, wo_ref[...], preferred_element_type=jnp.float32)
    y_g = jnp.dot(x, wg_ref[...], preferred_element_type=jnp.float32)
    y_o = y_o + bo_ref[...].astype(jnp.float32)
    y_g = y_g + bg_ref[...].astype(jnp.float32)
    o_ref[...] = (y_o * jax.nn.sigmoid(y_g)).astype(o_ref.dtype)


def _glu_kernel_multi_k(x_ref, wo_ref, wg_ref, bo_ref, bg_ref, o_ref,
                        acc_o, acc_g):
    # K is tiled; f32 accumulators live in VMEM scratch across the K axis.
    k = pl.program_id(2)
    nk = pl.num_programs(2)
    is_first = k == 0
    is_last = k == nk - 1

    x = x_ref[...]
    d_o = jnp.dot(x, wo_ref[...], preferred_element_type=jnp.float32)
    d_g = jnp.dot(x, wg_ref[...], preferred_element_type=jnp.float32)

    @pl.when(is_first)
    def _():
        # First partial product initialises the accumulator (no zero-fill pass).
        acc_o[...] = d_o
        acc_g[...] = d_g

    @pl.when(jnp.logical_and(jnp.logical_not(is_first), jnp.logical_not(is_last)))
    def _():
        acc_o[...] += d_o
        acc_g[...] += d_g

    @pl.when(is_last)
    def _():
        # Fold the last partial dot straight into the epilogue: saves one full
        # acc store + reload per output block on the scarce vst slot.
        y_o = acc_o[...] + d_o + bo_ref[...].astype(jnp.float32)
        y_g = acc_g[...] + d_g + bg_ref[...].astype(jnp.float32)
        o_ref[...] = (y_o * jax.nn.sigmoid(y_g)).astype(o_ref.dtype)


# ---------------------------------------------------------------------------
# Tiling helpers
# ---------------------------------------------------------------------------
def _pick_k_tile(in_features: int):
    """Return (k_tile, k_pad). Pads K to a multiple of 128 only when needed."""
    if in_features <= 1024:
        return in_features, 0
    for tk in (512, 256, 128):
        if in_features % tk == 0:
            return tk, 0
    # Pad K wrapper-side to the next multiple of 128; zero rows/cols contribute
    # nothing to the dot, so this is a numerical no-op.
    k_padded = ((in_features + 127) // 128) * 128
    for tk in (512, 256, 128):
        if k_padded % tk == 0:
            return tk, k_padded - in_features
    return 128, k_padded - in_features  # unreachable (k_padded % 128 == 0)


def _is_v7x() -> bool:
    try:
        kind = jax.devices()[0].device_kind.lower()
    except Exception:
        return False
    return "v7" in kind


def _megacore_split(rows: int, out_features: int, tm: int, tn: int):
    """On v7x (2 TCs/chip), make sure the parallel (M, N) grid has >= 2 blocks
    so both TensorCores get work. Prefer splitting M; fall back to N."""
    m_blocks = -(-rows // tm)
    n_blocks = -(-out_features // tn)
    if m_blocks * n_blocks >= 2:
        return tm, tn
    if rows >= 16:
        tm = ((((rows + 1) // 2) + 7) // 8) * 8          # multiple of 8 sublanes
    elif out_features >= 256:
        tn = ((((out_features + 1) // 2) + 127) // 128) * 128   # multiple of 128 lanes
    return tm, tn


# ---------------------------------------------------------------------------
# Wrapper
# ---------------------------------------------------------------------------
def gated_layer(x: jax.Array, w_t: jax.Array, b: jax.Array, *,
                compute_dtype=None, k_tile=None) -> jax.Array:
    """GLU forward. x: [..., in_features], w_t: [in, 2*out], b: [2*out].

    compute_dtype: optional matmul operand dtype (e.g. jnp.bfloat16 for
      MXU-native throughput); accumulation and epilogue stay in f32 and the
      output keeps x.dtype.
    k_tile: optional K-tile override (testing / tuning).
    """
    in_features, two_out = w_t.shape
    assert two_out % 2 == 0
    out_features = two_out // 2
    assert x.shape[-1] == in_features

    lead_shape = x.shape[:-1]
    out_dtype = x.dtype
    x2d = x.reshape(-1, in_features)
    rows = x2d.shape[0]

    # Split weight / bias into out & gate halves (lane-aligned matmuls, no
    # in-kernel slicing of a [.., 2*out] intermediate).
    w_out = w_t[:, :out_features]
    w_gate = w_t[:, out_features:]
    b_out = b[:out_features].reshape(1, out_features)
    b_gate = b[out_features:].reshape(1, out_features)

    if compute_dtype is not None:
        x2d = x2d.astype(compute_dtype)
        w_out = w_out.astype(compute_dtype)
        w_gate = w_gate.astype(compute_dtype)

    # ---- K tiling (pad so the tile always divides K) ----
    if k_tile is not None:
        tk = int(k_tile)
        k_pad = (-in_features) % tk
    else:
        tk, k_pad = _pick_k_tile(in_features)
    if k_pad:
        x2d = jnp.pad(x2d, ((0, 0), (0, k_pad)))
        w_out = jnp.pad(w_out, ((0, k_pad), (0, 0)))
        w_gate = jnp.pad(w_gate, ((0, k_pad), (0, 0)))
    k_total = in_features + k_pad
    nk = k_total // tk

    # ---- M/N tiling: big M tile cuts weight re-streaming (weights are
    #      re-fetched once per M block) ----
    tm = rows if rows <= 1024 else 1024
    tn = out_features if out_features <= 512 else 512
    if _is_v7x():
        tm, tn = _megacore_split(rows, out_features, tm, tn)

    m_blocks = pl.cdiv(rows, tm)
    n_blocks = pl.cdiv(out_features, tn)
    multi_k = nk > 1

    # ---- Explicit VMEM budget from the actual tile config ----
    in_isz = jnp.dtype(x2d.dtype).itemsize
    out_isz = jnp.dtype(out_dtype).itemsize
    b_isz = jnp.dtype(b.dtype).itemsize
    step_bytes = (
        2 * tm * tk * in_isz                 # x tile, double-buffered
        + 2 * 2 * tk * tn * in_isz           # W_out + W_gate tiles
        + 2 * 2 * tn * b_isz                 # bias tiles
        + 2 * tm * tn * out_isz              # output tile
        + (2 * tm * tn * 4 if multi_k else 0)  # f32 accumulators
    )
    vmem_limit = int(min(max(step_bytes * 3 // 2 + (1 << 20), 32 << 20), 56 << 20))

    compiler_params = pltpu.CompilerParams(
        dimension_semantics=(("parallel", "parallel", "arbitrary") if multi_k
                             else ("parallel", "parallel")),
        vmem_limit_bytes=vmem_limit,
    )
    cost = pl.CostEstimate(
        flops=4 * rows * out_features * in_features + 6 * rows * out_features,
        transcendentals=rows * out_features,
        bytes_accessed=(rows * k_total * in_isz
                        + 2 * k_total * out_features * in_isz * m_blocks
                        + 2 * out_features * b_isz
                        + rows * out_features * out_isz),
    )

    # TODO(synk): if profiling shows exposed DMA once operands are bf16
    # (HBM-bound), add pipeline_mode=pl.Buffered(3) on the x / W_out / W_gate
    # BlockSpecs (v6e/v7x; needs the raised vmem_limit above on v5e).
    # TODO(synk): for production shapes with out_features < 128, present a
    # lane-dense output (keep out|gate concatenated >=128 lanes, slice in the
    # wrapper) to avoid masked vst partial stores.
    if multi_k:
        grid = (m_blocks, n_blocks, nk)
        in_specs = [
            pl.BlockSpec((tm, tk), lambda i, j, k: (i, k)),   # x
            pl.BlockSpec((tk, tn), lambda i, j, k: (k, j)),   # W_out
            pl.BlockSpec((tk, tn), lambda i, j, k: (k, j)),   # W_gate
            pl.BlockSpec((1, tn), lambda i, j, k: (0, j)),    # b_out
            pl.BlockSpec((1, tn), lambda i, j, k: (0, j)),    # b_gate
        ]
        out_spec = pl.BlockSpec((tm, tn), lambda i, j, k: (i, j))
        scratch = [pltpu.VMEM((tm, tn), jnp.float32),
                   pltpu.VMEM((tm, tn), jnp.float32)]
        kernel = _glu_kernel_multi_k
    else:
        grid = (m_blocks, n_blocks)
        in_specs = [
            pl.BlockSpec((tm, tk), lambda i, j: (i, 0)),      # x
            pl.BlockSpec((tk, tn), lambda i, j: (0, j)),      # W_out
            pl.BlockSpec((tk, tn), lambda i, j: (0, j)),      # W_gate
            pl.BlockSpec((1, tn), lambda i, j: (0, j)),       # b_out
            pl.BlockSpec((1, tn), lambda i, j: (0, j)),       # b_gate
        ]
        out_spec = pl.BlockSpec((tm, tn), lambda i, j: (i, j))
        scratch = []
        kernel = _glu_kernel_single_k

    out2d = pl.pallas_call(
        kernel,
        out_shape=jax.ShapeDtypeStruct((rows, out_features), out_dtype),
        grid_spec=pltpu.PrefetchScalarGridSpec(
            num_scalar_prefetch=0,
            grid=grid,
            in_specs=in_specs,
            out_specs=out_spec,
            scratch_shapes=scratch,
        ),
        compiler_params=compiler_params,
        cost_estimate=cost,
    )(x2d, w_out, w_gate, b_out, b_gate)

    return out2d.reshape(*lead_shape, out_features)


# ---------------------------------------------------------------------------
# Params / reference
# ---------------------------------------------------------------------------
def init_params(key, in_features: int, out_features: int, dtype=jnp.float32):
    """Deterministic nn.Linear-style init: U(-1/sqrt(in), 1/sqrt(in))."""
    kw, kb = jax.random.split(key)
    bound = 1.0 / (in_features ** 0.5)
    # Torch stores weight as [2*out, in]; we keep the transposed layout.
    w_t = jax.random.uniform(
        kw, (in_features, 2 * out_features), dtype, minval=-bound, maxval=bound)
    b = jax.random.uniform(
        kb, (2 * out_features,), dtype, minval=-bound, maxval=bound)
    return w_t, b


def _reference(x, w_t, b, out_features):
    y = x @ w_t + b
    out_half, gate_half = y[..., :out_features], y[..., out_features:]
    return out_half * jax.nn.sigmoid(gate_half)


if __name__ == "__main__":
    key = jax.random.PRNGKey(0)
    keys = jax.random.split(key, 8)

    # 1) Primary small demo (matches module usage) — single-K fast path.
    batch, seq, in_f, out_f = 2, 8, 32, 32
    x = jax.random.normal(keys[0], (batch, seq, in_f), jnp.float32)
    w_t, b = init_params(keys[1], in_f, out_f)
    out = jax.block_until_ready(gated_layer(x, w_t, b))
    ref = _reference(x, w_t, b, out_f)
    assert out.shape == (batch, seq, out_f), out.shape
    assert jnp.allclose(out, ref, atol=1e-5, rtol=1e-5), (
        float(jnp.max(jnp.abs(out - ref))))

    # 2) Ragged M tile (rows=1100 > tm=1024): exercises masked boundary blocks.
    x2 = jax.random.normal(keys[2], (2, 550, 128), jnp.float32)
    w_t2, b2 = init_params(keys[3], 128, 160)
    out2 = jax.block_until_ready(gated_layer(x2, w_t2, b2))
    ref2 = _reference(x2, w_t2, b2, 160)
    assert out2.shape == (2, 550, 160), out2.shape
    assert jnp.allclose(out2, ref2, atol=1e-4, rtol=1e-4), (
        float(jnp.max(jnp.abs(out2 - ref2))))

    # 3) Multi-K accumulation path (forced via k_tile override).
    x3 = jax.random.normal(keys[4], (2, 64, 256), jnp.float32)
    w_t3, b3 = init_params(keys[5], 256, 160)
    out3 = jax.block_until_ready(gated_layer(x3, w_t3, b3, k_tile=128))
    ref3 = _reference(x3, w_t3, b3, 160)
    assert jnp.allclose(out3, ref3, atol=1e-4, rtol=1e-4), (
        float(jnp.max(jnp.abs(out3 - ref3))))

    # 4) K-padding path (in_features not a multiple of the K tile).
    x4 = jax.random.normal(keys[6], (2, 32, 200), jnp.float32)
    w_t4, b4 = init_params(keys[7], 200, 128)
    out4 = jax.block_until_ready(gated_layer(x4, w_t4, b4, k_tile=128))
    ref4 = _reference(x4, w_t4, b4, 128)
    assert jnp.allclose(out4, ref4, atol=1e-4, rtol=1e-4), (
        float(jnp.max(jnp.abs(out4 - ref4))))

    # 5) bf16 compute path (MXU-native matmuls, f32 accumulation).
    out5 = jax.block_until_ready(
        gated_layer(x3, w_t3, b3, compute_dtype=jnp.bfloat16, k_tile=128))
    assert jnp.allclose(out5, ref3, atol=3e-2, rtol=3e-2), (
        float(jnp.max(jnp.abs(out5 - ref3))))

    print("KERNEL_OK")
</pallas_src>

<mosaic_0001>
module attributes {stable_mosaic.version = 11 : i64} {
  func.func @_glu_kernel_single_k(%arg0: i32, %arg1: i32, %arg2: memref<16x32xf32, #tpu.memory_space<vmem>>, %arg3: memref<32x32xf32, #tpu.memory_space<vmem>>, %arg4: memref<32x32xf32, #tpu.memory_space<vmem>>, %arg5: memref<1x32xf32, #tpu.memory_space<vmem>>, %arg6: memref<1x32xf32, #tpu.memory_space<vmem>>, %arg7: memref<16x32xf32, #tpu.memory_space<vmem>>) attributes {dimension_semantics = [#tpu.dimension_semantics<parallel>, #tpu.dimension_semantics<parallel>], iteration_bounds = array<i64: 1, 1>, scalar_prefetch = 0 : i64, scratch_operands = 0 : i64, tpu.core_type = #tpu.core_type<tc>, window_params = [{transform_indices = @transform_0, window_bounds = array<i64: 16, 32>}, {transform_indices = @transform_1, window_bounds = array<i64: 32, 32>}, {transform_indices = @transform_2, window_bounds = array<i64: 32, 32>}, {transform_indices = @transform_3, window_bounds = array<i64: 1, 32>}, {transform_indices = @transform_4, window_bounds = array<i64: 1, 32>}, {transform_indices = @transform_5, window_bounds = array<i64: 16, 32>}]} {
    %c0 = arith.constant 0 : index
    %c0_0 = arith.constant 0 : index
    %0 = vector.load %arg2[%c0, %c0_0] : memref<16x32xf32, #tpu.memory_space<vmem>>, vector<16x32xf32>
    %c0_1 = arith.constant 0 : index
    %c0_2 = arith.constant 0 : index
    %1 = vector.load %arg3[%c0_1, %c0_2] : memref<32x32xf32, #tpu.memory_space<vmem>>, vector<32x32xf32>
    %cst = arith.constant dense<0.000000e+00> : vector<16x32xf32>
    %2 = tpu.matmul %0, %1, %cst {dimension_numbers = #tpu.dot_dimension_numbers<[1], [0], [0], [1], [0, 0, 1, 1], [], []>} : vector<16x32xf32>, vector<32x32xf32>, vector<16x32xf32> -> vector<16x32xf32>
    %c0_3 = arith.constant 0 : index
    %c0_4 = arith.constant 0 : index
    %3 = vector.load %arg4[%c0_3, %c0_4] : memref<32x32xf32, #tpu.memory_space<vmem>>, vector<32x32xf32>
    %cst_5 = arith.constant dense<0.000000e+00> : vector<16x32xf32>
    %4 = tpu.matmul %0, %3, %cst_5 {dimension_numbers = #tpu.dot_dimension_numbers<[1], [0], [0], [1], [0, 0, 1, 1], [], []>} : vector<16x32xf32>, vector<32x32xf32>, vector<16x32xf32> -> vector<16x32xf32>
    %c0_6 = arith.constant 0 : index
    %c0_7 = arith.constant 0 : index
    %5 = vector.load %arg5[%c0_6, %c0_7] : memref<1x32xf32, #tpu.memory_space<vmem>>, vector<1x32xf32>
    %6 = vector.broadcast %5 : vector<1x32xf32> to vector<16x32xf32>
    %7 = arith.addf %2, %6 : vector<16x32xf32>
    %c0_8 = arith.constant 0 : index
    %c0_9 = arith.constant 0 : index
    %8 = vector.load %arg6[%c0_8, %c0_9] : memref<1x32xf32, #tpu.memory_space<vmem>>, vector<1x32xf32>
    %9 = vector.broadcast %8 : vector<1x32xf32> to vector<16x32xf32>
    %10 = arith.addf %4, %9 : vector<16x32xf32>
    %11 = arith.negf %10 : vector<16x32xf32>
    %12 = math.exp %11 : vector<16x32xf32>
    %cst_10 = arith.constant 1.000000e+00 : f32
    %13 = vector.broadcast %cst_10 : f32 to vector<16x32xf32>
    %14 = arith.addf %13, %12 : vector<16x32xf32>
    %15 = arith.divf %13, %14 : vector<16x32xf32>
    %16 = arith.mulf %7, %15 : vector<16x32xf32>
    %c0_11 = arith.constant 0 : index
    %c0_12 = arith.constant 0 : index
    %17 = vector.load %arg7[%c0_11, %c0_12] : memref<16x32xf32, #tpu.memory_space<vmem>>, vector<16x32xf32>
    tpu.vector_store %arg7[%c0_11, %c0_12], %16 {strides = array<i32>} : memref<16x32xf32, #tpu.memory_space<vmem>>, vector<16x32xf32>,
    return
  }
  func.func @transform_0(%arg0: i32, %arg1: i32) -> (i32, i32) {
    %c0_i32 = arith.constant 0 : i32
    %c0_i32_0 = arith.constant 0 : i32
    return %arg0, %c0_i32 : i32, i32
  }
  func.func @transform_1(%arg0: i32, %arg1: i32) -> (i32, i32) {
    %c0_i32 = arith.constant 0 : i32
    %c0_i32_0 = arith.constant 0 : i32
    return %c0_i32, %arg1 : i32, i32
  }
  func.func @transform_2(%arg0: i32, %arg1: i32) -> (i32, i32) {
    %c0_i32 = arith.constant 0 : i32
    %c0_i32_0 = arith.constant 0 : i32
    return %c0_i32, %arg1 : i32, i32
  }
  func.func @transform_3(%arg0: i32, %arg1: i32) -> (i32, i32) {
    %c0_i32 = arith.constant 0 : i32
    %c0_i32_0 = arith.constant 0 : i32
    return %c0_i32, %arg1 : i32, i32
  }
  func.func @transform_4(%arg0: i32, %arg1: i32) -> (i32, i32) {
    %c0_i32 = arith.constant 0 : i32
    %c0_i32_0 = arith.constant 0 : i32
    return %c0_i32, %arg1 : i32, i32
  }
  func.func @transform_5(%arg0: i32, %arg1: i32) -> (i32, i32) {
    %c0_i32 = arith.constant 0 : i32
    return %arg0, %arg1 : i32, i32
  }
}

</mosaic_0001>

<bundles_post_ra>
// kernel: tpu_custom_call.1
= control target key start
LH: loop header
LB: loop body
LE: loop exit
PB: predicated region body
PF: predicated region fallthrough
CT: control target
= control target key end

     0   :  { %10 = vsyncpa [#allocation3], 0  ;;  %s558_s0 = inlined_call_operand.hbm [shape: f32[16,32], index: 0, kind: input, shape index: {}]   ;;  %s559_s1 = inlined_call_operand.hbm [shape: f32[32,32], index: 1, kind: input, shape index: {}]   ;;  %s560_s2 = inlined_call_operand.hbm [shape: f32[32,32], index: 2, kind: input, shape index: {}]   ;;  %s561_s3 = inlined_call_operand.vmem [shape: f32[1,32], index: 3, kind: input, shape index: {}]   ;;  %s562_s4 = inlined_call_operand.vmem [shape: f32[1,32], index: 4, kind: input, shape index: {}]   ;;  %s563_s5 = inlined_call_operand.hbm [shape: f32[16,32], index: 5, kind: output, shape index: {}]  }
   0x1   :  { %11 = vsyncpa [#allocation6], 0 }
   0x2   :  { %12 = vsyncpa [#allocation4], 0  ;;  %s443_s18 = smov [#allocation5]   ;;  %s444_s20 = smov [#allocation2]  }
   0x3   :  { %s30_s19 = sshll.u32 %s443_s18, 4  ;;  %s18_s21 = sshll.u32 %s444_s20, 4  ;;  %s31_s19 = int_to_ptr.vmem [resolvable:$true] %s30_s19  ;;  %s479_s21 = int_to_ptr.vmem [resolvable:$true] %s18_s21 }
   0x4   :  { %s349_s24 = scalar_lea.hbm %s559_s1, 512 }
   0x5   :  { %p350_p0 = scmp.ne.s32.totalorder %s559_s1, %s349_s24  ;;  %p353_p1 = scmp.lt.u32.totalorder %s349_s24, %s559_s1 }
   0x7   :  { %p355_p2 = pnand %p353_p1, %p350_p0 }
   0x9   :  { %358 = shalt.err (!%p355_p2)
}
   0xa   :  { %s359_s29 = scalar_lea.vmem %s31_s19, 512  ;;  %p364_p4 = scmp.lt.s32.totalorder %s31_s19, %s31_s19 }
   0xb   :  { %p360_p3 = scmp.ne.s32.totalorder %s31_s19, %s359_s29  ;;  %p365_p5 = scmp.lt.s32.totalorder %s359_s29, %s359_s29 }
   0xd   :  { %p366_p6 = por %p365_p5, %p364_p4 }
   0xf   :  { %p367_p7 = pnand %p366_p6, %p360_p3 }
  0x11   :  { %370 = shalt.err (!%p367_p7)
}
  0x12   :  { %s445_s30 = smov 128   ;;  %s446_s6 = smov 8  }
  0x13   :  { %36 = dma.hbm_to_vmem [thread:$0]  %s559_s1, 512, %s31_s19, [#allocation6], %s445_s30, %s445_s30, %s446_s6  }
  0x14   :  { %s371_s11 = scalar_lea.hbm %s558_s0, 256 }
  0x15   :  { %p372_p8 = scmp.ne.s32.totalorder %s558_s0, %s371_s11  ;;  %p375_p9 = scmp.lt.u32.totalorder %s371_s11, %s558_s0 }
  0x17   :  { %p377_p10 = pnand %p375_p9, %p372_p8 }
  0x19   :  { %380 = shalt.err (!%p377_p10)
}
  0x1a   :  { %s381_s16 = scalar_lea.vmem %s479_s21, 256  ;;  %p386_p12 = scmp.lt.s32.totalorder %s479_s21, %s479_s21 }
  0x1b   :  { %p382_p11 = scmp.ne.s32.totalorder %s479_s21, %s381_s16  ;;  %p387_p13 = scmp.lt.s32.totalorder %s381_s16, %s381_s16 }
  0x1d   :  { %p388_p0 = por %p387_p13, %p386_p12 }
  0x1f   :  { %p389_p1 = pnand %p388_p0, %p382_p11 }
  0x21   :  { %392 = shalt.err (!%p389_p1)
}
  0x22   :  { %24 = dma.hbm_to_vmem [thread:$0]  %s558_s0, 256, %s479_s21, [#allocation3], %s445_s30, %s445_s30, %s446_s6  }
  0x23   :  { %s447_s18 = smov [#allocation7]   ;;  %s393_s23 = scalar_lea.hbm %s560_s2, 512 }
  0x24   :  { %s42_s19 = sshll.u32 %s447_s18, 4  ;;  %p394_p2 = scmp.ne.s32.totalorder %s560_s2, %s393_s23  ;;  %s43_s19 = int_to_ptr.vmem [resolvable:$true] %s42_s19 }
  0x25   :  { %p397_p3 = scmp.lt.u32.totalorder %s393_s23, %s560_s2 }
  0x27   :  { %p399_p4 = pnand %p397_p3, %p394_p2 }
  0x29   :  { %402 = shalt.err (!%p399_p4)
}
  0x2a   :  { %s403_s28 = scalar_lea.vmem %s43_s19, 512  ;;  %p408_p6 = scmp.lt.s32.totalorder %s43_s19, %s43_s19 }
  0x2b   :  { %p404_p5 = scmp.ne.s32.totalorder %s43_s19, %s403_s28  ;;  %p409_p7 = scmp.lt.s32.totalorder %s403_s28, %s403_s28 }
  0x2d   :  { %p410_p8 = por %p409_p7, %p408_p6 }
  0x2f   :  { %p411_p9 = pnand %p410_p8, %p404_p5 }
  0x31   :  { %414 = shalt.err (!%p411_p9)
}
  0x32   :  { %48 = dma.hbm_to_vmem [thread:$0]  %s560_s2, 512, %s43_s19, [#allocation6], %s445_s30, %s445_s30, %s446_s6  }
  0x33   :  { %437 = dma.done.wait [#allocation3], 256  }
  0x34   :  { %438 = vsyncadd [#allocation3], 4294967040 }
  0x35   :  { %439 = dma.done.wait [#allocation6], 1024  }
  0x36   :  { %440 = vsyncadd [#allocation6], 4294966272  ;;  %vm79_vm0 = vcmask 261120   ;;  %v68_v0 = vld [vmem:[#allocation7] sm:$0xff]  ;;  %v69_v1 = vld [vmem:[#allocation7 + $0x8] sm:$0xff] }
  0x37   :  { %v70_v2 = vld [vmem:[#allocation7 + $0x10] sm:$0xff]  ;;  %v327_v3 = vpack.c.bf16 %v69_v1, %v68_v0  ;;  %v71_v4 = vld [vmem:[#allocation7 + $0x18] sm:$0xff]  ;;  %v64_v7 = vld [vmem:[#allocation5] sm:$0xff] }
  0x38   :  { %v62_v5 = vld [vmem:[#allocation2] sm:$0xff]  ;;  %v331_v6 = vpack.c.bf16 %v71_v4, %v70_v2  ;;  %v65_v8 = vld [vmem:[#allocation5 + $0x8] sm:$0xff]  ;;  %v67_v11 = vld [vmem:[#allocation5 + $0x18] sm:$0xff] }
  0x39   :  { %316 = vmatprep.mubr.msk.f32.mxu1 %vm79_vm0, %v62_v5  ;;  %v66_v9 = vld [vmem:[#allocation5 + $0x10] sm:$0xff]  ;;  %305 = vmatprep.mubr.msk.f32.mxu0 %vm79_vm0, %v62_v5  ;;  %v319_v10 = vpack.c.bf16 %v65_v8, %v64_v7  ;;  %v63_v13 = vld [vmem:[#allocation2 + $0x8] sm:$0xff] }
  0x3a   :  { %328 = vmatprep.subr.bf16.mxu1 %v327_v3  ;;  %v323_v12 = vpack.c.bf16 %v67_v11, %v66_v9  ;;  %v280_v14 = vld [vmem:[%s562_s4] ss:$0 sm:$0xff]  ;;  %s448_s4 = smov [#allocation8]  }
  0x3b   :  { %330 = vmatpush3.bf16.msra.mxu1 %v327_v3  ;;  %320 = vmatprep.subr.bf16.mxu0 %v319_v10  ;;  %v277_v27 = vld [vmem:[%s561_s3] ss:$0 sm:$0xff]  ;;  %s264_s9 = sshll.u32 %s448_s4, 4  ;;  %s265_s9 = int_to_ptr.vmem [resolvable:$true] %s264_s9 }
  0x3c   :  { %332 = vmatprep.subr.bf16.mxu1 %v331_v6  ;;  %322 = vmatpush3.bf16.msra.mxu0 %v319_v10  ;;  %s415_s10 = scalar_lea.vmem %s265_s9, 256  ;;  %p420_p11 = scmp.lt.s32.totalorder %s265_s9, %s265_s9 }
  0x3d   :  { %324 = vmatprep.subr.bf16.mxu0 %v323_v12  ;;  %p416_p10 = scmp.ne.s32.totalorder %s265_s9, %s415_s10  ;;  %p421_p12 = scmp.lt.s32.totalorder %s415_s10, %s415_s10 }
  0x3f   :  { %334 = vmatpush3.bf16.msra.mxu1 %v331_v6  ;;  %p422_p13 = por %p421_p12, %p420_p11 }
  0x40   :  { %326 = vmatpush3.bf16.msra.mxu0 %v323_v12 }
  0x41   :  { %p423_p0 = pnand %p422_p13, %p416_p10 }
  0x42   :  { %317 = vmatmul.mubr.msk.f32.vlgmr.msra.gmra.mrb[0].mxu1 %vm79_vm0, %v63_v13 }
  0x43   :  { %306 = vmatmul.mubr.msk.f32.vlgmr.msra.gmra.mrb[0].mxu0 %vm79_vm0, %v63_v13 }
 0x115   :  { %v318_v15 = vpop.f32.mrb[0].mxu1 }
 0x116   :  { %v240_v16 = vadd.f32 %v318_v15, %v280_v14  ;;  %v234_v17 = vpop.f32.mrb[1].mxu1  ;;  %v307_v19 = vpop.f32.mrb[0].mxu0 }
 0x117   :  { %v235_v18 = vadd.f32 %v280_v14, %v234_v17  ;;  %v152_v21 = vpop.f32.mrb[1].mxu0  ;;  %v158_v28 = vadd.f32 %v307_v19, %v277_v27 }
 0x118   :  { %v284_v20 = vmul.f32 -1.442695, %v240_v16  ;;  %v153_v29 = vadd.f32 %v277_v27, %v152_v21 }
 0x119   :  { %v283_v22 = vmul.f32 -1.442695, %v235_v18 }
 0x11a   :  { %341 = vpow2.f32 %v284_v20 }
 0x11b   :  { %343 = vpow2.f32 %v283_v22 }
 0x124   :  { %v342_v23 = vpop.eup %341 }
 0x125   :  { %v344_v24 = vpop.eup %343  ;;  %v250_v25 = vadd.f32 1.0, %v342_v23 }
 0x126   :  { %v249_v26 = vadd.f32 1.0, %v344_v24 }
 0x127   :  { %345 = vrcp.f32 %v250_v25 }
 0x128   :  { %347 = vrcp.f32 %v249_v26 }
 0x131   :  { %v346_v30 = vpop.eup %345 }
 0x132   :  { %v348_v31 = vpop.eup %347  ;;  %v256_v32 = vmul.f32 %v346_v30, %v158_v28 }
 0x133   :  { %v255_v33 = vmul.f32 %v348_v31, %v153_v29 }
 0x134   :  { %258 = vst.msk [vmem:[#allocation8 + $0x8] sm:$0xff] %vm79_vm0, %v256_v32 }
 0x135   :  { %257 = vst.msk [vmem:[#allocation8] sm:$0xff] %vm79_vm0, %v255_v33 }
 0x136   :  { %426 = shalt.err (!%p423_p0)
}
 0x137   :  { %s427_s12 = scalar_lea.hbm %s563_s5, 256 }
 0x138   :  { %p428_p1 = scmp.ne.s32.totalorder %s563_s5, %s427_s12  ;;  %p431_p2 = scmp.lt.u32.totalorder %s427_s12, %s563_s5 }
 0x13a   :  { %p433_p3 = pnand %p431_p2, %p428_p1 }
 0x13c   :  { %436 = shalt.err (!%p433_p3)
}
 0x13d   :  { %270 = dma.vmem_to_hbm [thread:$0]  %s265_s9, 256, %s563_s5, [#allocation4], %s445_s30, %s445_s30, %s446_s6  }
 0x13e   :  { %441 = dma.done.wait [#allocation4], 256  }
 0x13f   :  { %442 = vsyncadd [#allocation4], 4294967040 }
 0x140   :  { %274 = vsyncpa [#allocation3], 1 }
 0x141   :  { %275 = vsyncpa [#allocation6], 1 }
 0x142   :  { %276 = vsyncpa [#allocation4], 1 }

</bundles_post_ra>
